<compile_context>
chip_gen: v5e
topology: v5e:2x2
jax: 0.10.0
libtpu: 0.0.40
codegen_flags: <defaults>
</compile_context>

<pallas_src>
import functools
from typing import NamedTuple

import jax
import jax.numpy as jnp
from jax import lax
from jax.experimental import pallas as pl
from jax.experimental.pallas import tpu as pltpu

_BN_EPS = 1e-5  # nn.BatchNorm1d default


# ----------------------------------------------------------------------------- helpers
def _round_up(n, m):
    return ((n + m - 1) // m) * m


def _pad_feature(n):
    # >=128: keep lane-dense 128 pad (overhead already small).  Small dims: pad to 16
    # (bf16 sublane pack) only -- full-array blocks are exempt from the (8,128) rule.
    return _round_up(n, 128) if n >= 128 else _round_up(n, 16)


def _pad2(a, rows, cols):
    pr, pc = rows - a.shape[0], cols - a.shape[1]
    if pr or pc:
        a = jnp.pad(a, ((0, pr), (0, pc)))
    return a


@functools.lru_cache(maxsize=1)
def _vmem_limit_bytes():
    cap = 64 * 1024 * 1024
    try:
        info = pltpu.get_tpu_info()
        cap = int(getattr(info, "vmem_capacity_bytes", cap) or cap)
    except Exception:  # not on TPU / API unavailable -> conservative (v7x) default
        pass
    if cap >= 128 * 1024 * 1024:      # v5e / v6e
        return 100 * 1024 * 1024
    return 56 * 1024 * 1024           # v7x (64 MiB physical)


# ----------------------------------------------------------------------------- params
class PackedParams(NamedTuple):
    w1: jax.Array      # (di_p, h_p)  bf16
    gamma: jax.Array   # (1, h_p)     f32
    beta: jax.Array    # (1, h_p)     f32
    w2: jax.Array      # (h_p, do_p)  bf16
    b2: jax.Array      # (1, do_p)    f32
    d_in: int
    h_size: int
    d_out: int


def pack_params(w1, b1, gamma, beta, w2, b2):
    """Pad + cast parameters once (hoisted out of the per-call path).

    b1 is accepted for API parity with the PyTorch module but intentionally dropped:
    training-mode BatchNorm subtracts the per-feature batch mean, which exactly cancels
    any per-feature constant added by fc1.
    """
    del b1
    d_in, h_size = w1.shape
    d_out = w2.shape[1]
    di_p, h_p, do_p = _pad_feature(d_in), _pad_feature(h_size), _pad_feature(d_out)
    w1_p = _pad2(jnp.asarray(w1, jnp.float32), di_p, h_p).astype(jnp.bfloat16)
    w2_p = _pad2(jnp.asarray(w2, jnp.float32), h_p, do_p).astype(jnp.bfloat16)
    g_p = _pad2(jnp.asarray(gamma, jnp.float32).reshape(1, -1), 1, h_p)
    be_p = _pad2(jnp.asarray(beta, jnp.float32).reshape(1, -1), 1, h_p)
    b2_p = _pad2(jnp.asarray(b2, jnp.float32).reshape(1, -1), 1, do_p)
    return PackedParams(w1_p, g_p, be_p, w2_p, b2_p, d_in, h_size, d_out)


# ----------------------------------------------------------------------------- kernels
def _fused_kernel(nvalid_ref, inv_ref, x_ref, w1_ref, gamma_ref, beta_ref,
                  w2_ref, b2_ref, o_ref):
    """Single-block fused fc1 -> BN(train) -> ReLU -> fc2 (small B*H fast path)."""
    n_valid = nvalid_ref[0, 0]          # true batch size (SMEM scalar)
    inv_b = inv_ref[0, 0]               # 1 / true batch size (SMEM scalar)

    # fc1 (no bias: cancelled by training-mode BN); bf16 feeds, f32 MXU accumulation.
    h = jnp.dot(x_ref[...], w1_ref[...], preferred_element_type=jnp.float32)

    # Batch mean (zero-padded rows contribute exactly 0) and CENTERED variance with a
    # row-validity mask (padded rows would otherwise contribute mean^2 each).
    mean = jnp.sum(h, axis=0, keepdims=True) * inv_b
    hc = h - mean
    row = lax.broadcasted_iota(jnp.int32, hc.shape, 0)
    hc_valid = jnp.where(row < n_valid, hc, 0.0)
    var = jnp.sum(hc_valid * hc_valid, axis=0, keepdims=True) * inv_b

    # Fold gamma into the rsqrt path: one mul + one add on the (B,H) tile.
    scale = gamma_ref[...] * lax.rsqrt(var + _BN_EPS)
    h_act = jnp.maximum(hc * scale + beta_ref[...], 0.0)

    out = jnp.dot(h_act.astype(w2_ref.dtype), w2_ref[...],
                  preferred_element_type=jnp.float32) + b2_ref[...]
    o_ref[...] = out.astype(o_ref.dtype)


def _bn_stats_kernel(x_ref, w1_ref, s1_ref, s2_ref):
    """Pass 1 (batch-tiled): accumulate per-feature sum / sum-of-squares of fc1 output.

    s1/s2 are resident (1, H_p) output blocks (constant block index across the
    'arbitrary' batch-tile axis).  Zero-padded batch rows contribute exactly 0 because
    no fc1 bias is added, so dividing by the true batch size later gives exact stats.
    """
    @pl.when(pl.program_id(0) == 0)
    def _():
        s1_ref[...] = jnp.zeros_like(s1_ref)
        s2_ref[...] = jnp.zeros_like(s2_ref)

    h = jnp.dot(x_ref[...], w1_ref[...], preferred_element_type=jnp.float32)
    s1_ref[...] += jnp.sum(h, axis=0, keepdims=True)
    s2_ref[...] += jnp.sum(h * h, axis=0, keepdims=True)


def _norm_fc2_kernel(x_ref, w1_ref, scale_ref, shift_ref, w2_ref, b2_ref, o_ref):
    """Pass 2 (batch-tiled): recompute the fc1 tile, apply folded BN + ReLU, then fc2."""
    h = jnp.dot(x_ref[...], w1_ref[...], preferred_element_type=jnp.float32)
    h_act = jnp.maximum(h * scale_ref[...] + shift_ref[...], 0.0)
    out = jnp.dot(h_act.astype(w2_ref.dtype), w2_ref[...],
                  preferred_element_type=jnp.float32) + b2_ref[...]
    o_ref[...] = out.astype(o_ref.dtype)


# ----------------------------------------------------------------------------- wrappers
def _fused_forward(x, p):
    B = x.shape[0]
    di_p, h_p = p.w1.shape
    do_p = p.w2.shape[1]
    b_p = _round_up(B, 16)                      # bf16 MXU LHS: 16 rows per packed sublane
    x_p = _pad2(x.astype(jnp.bfloat16), b_p, di_p)

    n_valid = jnp.array([[B]], dtype=jnp.int32)
    inv_b = jnp.array([[1.0 / B]], dtype=jnp.float32)

    vmem = pl.BlockSpec(memory_space=pltpu.MemorySpace.VMEM)
    smem = pl.BlockSpec(memory_space=pltpu.MemorySpace.SMEM)
    out_p = pl.pallas_call(
        _fused_kernel,
        out_shape=jax.ShapeDtypeStruct((b_p, do_p), jnp.float32),
        in_specs=[smem, smem, vmem, vmem, vmem, vmem, vmem, vmem],
        out_specs=vmem,
        compiler_params=pltpu.CompilerParams(vmem_limit_bytes=_vmem_limit_bytes()),
    )(n_valid, inv_b, x_p, p.w1, p.gamma, p.beta, p.w2, p.b2)
    return out_p[:B, :p.d_out]


def _tiled_forward(x, p, batch_tile):
    B = x.shape[0]
    di_p, h_p = p.w1.shape
    do_p = p.w2.shape[1]
    tb = _round_up(max(16, min(batch_tile, _round_up(B, 16))), 16)
    b_p = _round_up(B, tb)
    nt = b_p // tb
    x_p = _pad2(x.astype(jnp.bfloat16), b_p, di_p)
    limit = _vmem_limit_bytes()

    # Pass 1: per-feature batch statistics, accumulated over an 'arbitrary' grid axis.
    s1, s2 = pl.pallas_call(
        _bn_stats_kernel,
        grid=(nt,),
        in_specs=[
            pl.BlockSpec((tb, di_p), lambda i: (i, 0)),
            pl.BlockSpec((di_p, h_p), lambda i: (0, 0)),
        ],
        out_specs=(
            pl.BlockSpec((1, h_p), lambda i: (0, 0)),
            pl.BlockSpec((1, h_p), lambda i: (0, 0)),
        ),
        out_shape=(
            jax.ShapeDtypeStruct((1, h_p), jnp.float32),
            jax.ShapeDtypeStruct((1, h_p), jnp.float32),
        ),
        compiler_params=pltpu.CompilerParams(
            dimension_semantics=("arbitrary",), vmem_limit_bytes=limit),
    )(x_p, p.w1)

    # Tiny per-feature epilogue (H elements) in plain JAX: fold gamma/mean into
    # a single scale/shift.
    # TODO(synk): E[h^2]-mean^2 can lose precision when |mean| >> std; add a third
    # (mean-shifted) stats pass if that accuracy ever matters.
    inv_b = 1.0 / B
    mean = s1 * inv_b
    var = jnp.maximum(s2 * inv_b - mean * mean, 0.0)
    scale = p.gamma * lax.rsqrt(var + _BN_EPS)
    shift = p.beta - mean * scale

    # Pass 2: normalize + ReLU + fc2 per batch tile, 'parallel' axis (both TCs on v7x).
    out_p = pl.pallas_call(
        _norm_fc2_kernel,
        grid=(nt,),
        in_specs=[
            pl.BlockSpec((tb, di_p), lambda i: (i, 0)),
            pl.BlockSpec((di_p, h_p), lambda i: (0, 0)),
            pl.BlockSpec((1, h_p), lambda i: (0, 0)),
            pl.BlockSpec((1, h_p), lambda i: (0, 0)),
            pl.BlockSpec((h_p, do_p), lambda i: (0, 0)),
            pl.BlockSpec((1, do_p), lambda i: (0, 0)),
        ],
        out_specs=pl.BlockSpec((tb, do_p), lambda i: (i, 0)),
        out_shape=jax.ShapeDtypeStruct((b_p, do_p), jnp.float32),
        compiler_params=pltpu.CompilerParams(
            dimension_semantics=("parallel",), vmem_limit_bytes=limit),
    )(x_p, p.w1, scale, shift, p.w2, p.b2)
    return out_p[:B, :p.d_out]


def bco_fc_forward_packed(x, p, *, batch_tile=None, force_tiled=False):
    """Forward pass of BCOAgentFC (training-mode BatchNorm1d semantics)."""
    B = x.shape[0]
    assert x.shape[1] == p.d_in
    di_p, h_p = p.w1.shape
    do_p = p.w2.shape[1]
    b_p = _round_up(B, 16)
    # Rough resident-VMEM estimate for the single-block fast path.
    est = (2 * b_p * di_p + 2 * di_p * h_p + 2 * h_p * do_p
           + 4 * b_p * do_p + 12 * b_p * h_p + 64 * h_p + 16 * do_p)
    if force_tiled or est > _vmem_limit_bytes() - 8 * 1024 * 1024:
        return _tiled_forward(x, p, batch_tile or 512)
    return _fused_forward(x, p)


def bco_fc_forward(x, w1, b1, gamma, beta, w2, b2, **kw):
    """Convenience wrapper (packs per call); prefer pack_params once + *_packed."""
    return bco_fc_forward_packed(x, pack_params(w1, b1, gamma, beta, w2, b2), **kw)


# ----------------------------------------------------------------------------- init/ref
def init_params(key, n_inputs, h_size, n_outputs):
    """Deterministic init mirroring PyTorch nn.Linear default (U(-1/sqrt(fan_in), +))."""
    k1, k2, k3, k4 = jax.random.split(key, 4)
    bnd1 = 1.0 / jnp.sqrt(n_inputs)
    bnd2 = 1.0 / jnp.sqrt(h_size)
    w1 = jax.random.uniform(k1, (n_inputs, h_size), jnp.float32, -bnd1, bnd1)
    b1 = jax.random.uniform(k2, (1, h_size), jnp.float32, -bnd1, bnd1)
    w2 = jax.random.uniform(k3, (h_size, n_outputs), jnp.float32, -bnd2, bnd2)
    b2 = jax.random.uniform(k4, (1, n_outputs), jnp.float32, -bnd2, bnd2)
    gamma = jnp.ones((1, h_size), jnp.float32)   # BatchNorm1d weight
    beta = jnp.zeros((1, h_size), jnp.float32)   # BatchNorm1d bias
    return w1, b1, gamma, beta, w2, b2


def reference_forward_module(x, w1, b1, gamma, beta, w2, b2):
    """Exact PyTorch-module semantics in float32 (fc1 bias included)."""
    h = jnp.dot(x, w1, precision=lax.Precision.HIGHEST) + b1
    mean = jnp.mean(h, axis=0, keepdims=True)
    var = jnp.mean((h - mean) ** 2, axis=0, keepdims=True)
    h = (h - mean) / jnp.sqrt(var + _BN_EPS) * gamma + beta
    h = jnp.maximum(h, 0.0)
    return jnp.dot(h, w2, precision=lax.Precision.HIGHEST) + b2


def reference_forward_matched(x, w1, b1, gamma, beta, w2, b2):
    """Reference mirroring the fused kernel's bf16 MXU feeds / f32 centered-var math."""
    del b1  # cancelled by training-mode BN
    xb = x.astype(jnp.bfloat16).astype(jnp.float32)
    w1b = w1.astype(jnp.bfloat16).astype(jnp.float32)
    w2b = w2.astype(jnp.bfloat16).astype(jnp.float32)
    h = jnp.dot(xb, w1b, precision=lax.Precision.HIGHEST)
    mean = jnp.mean(h, axis=0, keepdims=True)
    hc = h - mean
    var = jnp.mean(hc * hc, axis=0, keepdims=True)
    scale = gamma * lax.rsqrt(var + _BN_EPS)
    ha = jnp.maximum(hc * scale + beta, 0.0)
    hab = ha.astype(jnp.bfloat16).astype(jnp.float32)
    return jnp.dot(hab, w2b, precision=lax.Precision.HIGHEST) + b2


# ----------------------------------------------------------------------------- main
if __name__ == "__main__":
    key = jax.random.PRNGKey(0)
    kx, kp, kx2 = jax.random.split(key, 3)

    batch, n_inputs, h_size, n_outputs = 8, 16, 16, 4
    x = jax.random.normal(kx, (batch, n_inputs), jnp.float32)
    params = init_params(kp, n_inputs, h_size, n_outputs)
    packed = pack_params(*params)          # pad/cast weights ONCE

    # Single-block fused fast path.
    out = jax.block_until_ready(bco_fc_forward_packed(x, packed))
    assert out.shape == (batch, n_outputs)
    ref_tight = reference_forward_matched(x, *params)
    ref_module = reference_forward_module(x, *params)
    assert jnp.allclose(out, ref_tight, atol=2e-3, rtol=2e-3), "kernel vs matched ref"
    assert jnp.allclose(out, ref_module, atol=1e-1, rtol=1e-1), "kernel vs f32 module ref"

    # Exercise the batch-tiled two-pass pipeline (auto-selected for large B; forced
    # here at a small size with 64-row tiles so padded batch rows are also covered).
    big_b = 160
    x_big = jax.random.normal(kx2, (big_b, n_inputs), jnp.float32)
    out_big = jax.block_until_ready(
        bco_fc_forward_packed(x_big, packed, batch_tile=64, force_tiled=True))
    assert out_big.shape == (big_b, n_outputs)
    ref_big = reference_forward_module(x_big, *params)
    assert jnp.allclose(out_big, ref_big, atol=1e-1, rtol=1e-1), "tiled kernel vs module ref"

    print("KERNEL_OK")
</pallas_src>

<mosaic_0001>
module attributes {stable_mosaic.version = 11 : i64} {
  func.func @_fused_kernel(%arg0: memref<1x1xi32, #tpu.memory_space<smem>>, %arg1: memref<1x1xf32, #tpu.memory_space<smem>>, %arg2: memref<16x16xbf16, #tpu.memory_space<vmem>>, %arg3: memref<16x16xbf16, #tpu.memory_space<vmem>>, %arg4: memref<1x16xf32, #tpu.memory_space<vmem>>, %arg5: memref<1x16xf32, #tpu.memory_space<vmem>>, %arg6: memref<16x16xbf16, #tpu.memory_space<vmem>>, %arg7: memref<1x16xf32, #tpu.memory_space<vmem>>, %arg8: memref<16x16xf32, #tpu.memory_space<vmem>>) attributes {dimension_semantics = [], scalar_prefetch = 0 : i64, scratch_operands = 0 : i64, tpu.core_type = #tpu.core_type<tc>} {
    %c0 = arith.constant 0 : index
    %c0_0 = arith.constant 0 : index
    %0 = memref.load %arg0[%c0, %c0_0] : memref<1x1xi32, #tpu.memory_space<smem>>
    %c0_1 = arith.constant 0 : index
    %c0_2 = arith.constant 0 : index
    %1 = memref.load %arg1[%c0_1, %c0_2] : memref<1x1xf32, #tpu.memory_space<smem>>
    %c0_3 = arith.constant 0 : index
    %c0_4 = arith.constant 0 : index
    %2 = vector.load %arg2[%c0_3, %c0_4] : memref<16x16xbf16, #tpu.memory_space<vmem>>, vector<16x16xbf16>
    %c0_5 = arith.constant 0 : index
    %c0_6 = arith.constant 0 : index
    %3 = vector.load %arg3[%c0_5, %c0_6] : memref<16x16xbf16, #tpu.memory_space<vmem>>, vector<16x16xbf16>
    %cst = arith.constant dense<0.000000e+00> : vector<16x16xf32>
    %4 = tpu.matmul %2, %3, %cst {dimension_numbers = #tpu.dot_dimension_numbers<[1], [0], [0], [1], [0, 0, 1, 1], [], []>} : vector<16x16xbf16>, vector<16x16xbf16>, vector<16x16xf32> -> vector<16x16xf32>
    %cst_7 = arith.constant dense<0.000000e+00> : vector<16xf32>
    %5 = vector.multi_reduction <add>, %4, %cst_7 [0] : vector<16x16xf32> to vector<16xf32>
    %6 = vector.shape_cast %5 : vector<16xf32> to vector<1x16xf32>
    %7 = vector.broadcast %1 : f32 to vector<1x16xf32>
    %8 = arith.mulf %6, %7 : vector<1x16xf32>
    %9 = vector.broadcast %8 : vector<1x16xf32> to vector<16x16xf32>
    %10 = arith.subf %4, %9 : vector<16x16xf32>
    %11 = tpu.iota {dimensions = array<i32: 0>} : vector<16x16xi32>
    %12 = vector.broadcast %0 : i32 to vector<16x16xi32>
    %13 = arith.cmpi slt, %11, %12 : vector<16x16xi32>
    %cst_8 = arith.constant 0.000000e+00 : f32
    %14 = vector.broadcast %cst_8 : f32 to vector<16x16xf32>
    %15 = arith.select %13, %10, %14 : vector<16x16xi1>, vector<16x16xf32>
    %16 = arith.mulf %15, %15 : vector<16x16xf32>
    %cst_9 = arith.constant dense<0.000000e+00> : vector<16xf32>
    %17 = vector.multi_reduction <add>, %16, %cst_9 [0] : vector<16x16xf32> to vector<16xf32>
    %18 = vector.shape_cast %17 : vector<16xf32> to vector<1x16xf32>
    %19 = vector.broadcast %1 : f32 to vector<1x16xf32>
    %20 = arith.mulf %18, %19 : vector<1x16xf32>
    %c0_10 = arith.constant 0 : index
    %c0_11 = arith.constant 0 : index
    %21 = vector.load %arg4[%c0_10, %c0_11] : memref<1x16xf32, #tpu.memory_space<vmem>>, vector<1x16xf32>
    %cst_12 = arith.constant 9.99999974E-6 : f32
    %22 = vector.broadcast %cst_12 : f32 to vector<1x16xf32>
    %23 = arith.addf %20, %22 : vector<1x16xf32>
    %24 = math.rsqrt %23 : vector<1x16xf32>
    %25 = arith.mulf %21, %24 : vector<1x16xf32>
    %26 = vector.broadcast %25 : vector<1x16xf32> to vector<16x16xf32>
    %27 = arith.mulf %10, %26 : vector<16x16xf32>
    %c0_13 = arith.constant 0 : index
    %c0_14 = arith.constant 0 : index
    %28 = vector.load %arg5[%c0_13, %c0_14] : memref<1x16xf32, #tpu.memory_space<vmem>>, vector<1x16xf32>
    %29 = vector.broadcast %28 : vector<1x16xf32> to vector<16x16xf32>
    %30 = arith.addf %27, %29 : vector<16x16xf32>
    %cst_15 = arith.constant 0.000000e+00 : f32
    %31 = vector.broadcast %cst_15 : f32 to vector<16x16xf32>
    %32 = arith.maximumf %30, %31 : vector<16x16xf32>
    %33 = arith.truncf %32 : vector<16x16xf32> to vector<16x16xbf16>
    %c0_16 = arith.constant 0 : index
    %c0_17 = arith.constant 0 : index
    %34 = vector.load %arg6[%c0_16, %c0_17] : memref<16x16xbf16, #tpu.memory_space<vmem>>, vector<16x16xbf16>
    %cst_18 = arith.constant dense<0.000000e+00> : vector<16x16xf32>
    %35 = tpu.matmul %33, %34, %cst_18 {dimension_numbers = #tpu.dot_dimension_numbers<[1], [0], [0], [1], [0, 0, 1, 1], [], []>} : vector<16x16xbf16>, vector<16x16xbf16>, vector<16x16xf32> -> vector<16x16xf32>
    %c0_19 = arith.constant 0 : index
    %c0_20 = arith.constant 0 : index
    %36 = vector.load %arg7[%c0_19, %c0_20] : memref<1x16xf32, #tpu.memory_space<vmem>>, vector<1x16xf32>
    %37 = vector.broadcast %36 : vector<1x16xf32> to vector<16x16xf32>
    %38 = arith.addf %35, %37 : vector<16x16xf32>
    %c0_21 = arith.constant 0 : index
    %c0_22 = arith.constant 0 : index
    %39 = vector.load %arg8[%c0_21, %c0_22] : memref<16x16xf32, #tpu.memory_space<vmem>>, vector<16x16xf32>
    tpu.vector_store %arg8[%c0_21, %c0_22], %38 {strides = array<i32>} : memref<16x16xf32, #tpu.memory_space<vmem>>, vector<16x16xf32>,
    return
  }
}

</mosaic_0001>

<bundles_post_ra>
// kernel: tpu_custom_call.1
= control target key start
LH: loop header
LB: loop body
LE: loop exit
PB: predicated region body
PF: predicated region fallthrough
CT: control target
= control target key end

     0   :  { %15 = vsyncpa [#allocation5], 0  ;;  %s445_s0 = inlined_call_operand.<no memory space> [shape: s32[1,1], index: 0, kind: input, shape index: {}]   ;;  %s446_s1 = inlined_call_operand.<no memory space> [shape: f32[1,1], index: 1, kind: input, shape index: {}]   ;;  %s447_s2 = inlined_call_operand.hbm [shape: bf16[16,16], index: 2, kind: input, shape index: {}]   ;;  %s448_s3 = inlined_call_operand.hbm [shape: bf16[16,16], index: 3, kind: input, shape index: {}]   ;;  %s449_s4 = inlined_call_operand.vmem [shape: f32[1,16], index: 4, kind: input, shape index: {}]   ;;  %s450_s5 = inlined_call_operand.vmem [shape: f32[1,16], index: 5, kind: input, shape index: {}]   ;;  %s451_s6 = inlined_call_operand.hbm [shape: bf16[16,16], index: 6, kind: input, shape index: {}]   ;;  %s452_s7 = inlined_call_operand.vmem [shape: f32[1,16], index: 7, kind: input, shape index: {}]   ;;  %s453_s8 = inlined_call_operand.hbm [shape: f32[16,16], index: 8, kind: output, shape index: {}]  }
   0x1   :  { %16 = vsyncpa [#allocation8], 0 }
   0x2   :  { %17 = vsyncpa [#allocation6], 0  ;;  %s39_s29 = sshll.u32 %s448_s3, 4  ;;  %s357_s30 = smov [#allocation7]   ;;  %s40_s29 = int_to_ptr.hbm [resolvable:$true] %s39_s29 }
   0x3   :  { %s41_s9 = sshll.u32 %s357_s30, 4  ;;  %s26_s12 = sshll.u32 %s447_s2, 4  ;;  %s42_s9 = int_to_ptr.vmem [resolvable:$true] %s41_s9  ;;  %s27_s12 = int_to_ptr.hbm [resolvable:$true] %s26_s12 }
   0x4   :  { %s358_s13 = smov 64   ;;  %s359_s14 = smov 4  }
   0x5   :  { %47 = dma.hbm_to_vmem [thread:$0]  %s40_s29, 128, %s42_s9, [#allocation8], %s358_s13, %s358_s13, %s359_s14  }
   0x6   :  { %s360_s15 = smov [#allocation4]   ;;  %s56_s19 = sshll.u32 %s451_s6, 4  ;;  %s57_s19 = int_to_ptr.hbm [resolvable:$true] %s56_s19 }
   0x7   :  { %s28_s16 = sshll.u32 %s360_s15, 4  ;;  %s361_s3 = smov [#allocation9]   ;;  %s29_s16 = int_to_ptr.vmem [resolvable:$true] %s28_s16 }
   0x8   :  { %34 = dma.hbm_to_vmem [thread:$0]  %s27_s12, 128, %s29_s16, [#allocation5], %s358_s13, %s358_s13, %s359_s14  }
   0x9   :  { %s58_s20 = sshll.u32 %s361_s3, 4  ;;  %s59_s20 = int_to_ptr.vmem [resolvable:$true] %s58_s20 }
   0xa   :  { %64 = dma.hbm_to_vmem [thread:$0]  %s57_s19, 128, %s59_s20, [#allocation8], %s358_s13, %s358_s13, %s359_s14  }
   0xb   :  { %351 = dma.done.wait [#allocation5], 128  }
   0xc   :  { %352 = vsyncadd [#allocation5], 4294967168 }
   0xd   :  { %353 = dma.done.wait [#allocation8], 256  }
   0xe   :  { %354 = vsyncadd [#allocation8], 4294967040  ;;  %v241_v0 = vld [vmem:[#allocation7] sm:$0xff]  ;;  %v240_v1 = vld [vmem:[#allocation4] sm:$0xff]  ;;  %vm97_vm0 = vcmask 130048   ;;  %v128_v8 = vlaneseq  ;;  %v124_v14 = vstv %s446_s1  ;;  %v131_v17 = vstv %s445_s0  ;;  %s362_s26 = smov [#allocation10]  }
   0xf   :  { %108 = vmatpush.bf16.msra.mxu0 %v241_v0  ;;  %v242_v33 = vld [vmem:[#allocation9] sm:$0xff]  ;;  %v148_v42 = vld [vmem:[%s449_s4] sm:$0x1]  ;;  %s210_s27 = sshll.u32 %s362_s26, 4  ;;  %s212_s29 = sshll.u32 %s453_s8, 4  ;;  %s211_s27 = int_to_ptr.vmem [resolvable:$true] %s210_s27  ;;  %s213_s29 = int_to_ptr.hbm [resolvable:$true] %s212_s29 }
  0x10   :  { %v129_v11 = vshrl.u32 %v128_v8, 7  ;;  %197 = vmatpush.bf16.msra.mxu1 %v242_v33  ;;  %v251_v47 = vld [vmem:[%s450_s5] ss:$0 sm:$0xff]  ;;  %s363_s30 = smov 128   ;;  %s364_s9 = smov 8  }
  0x11   :  { %v252_v55 = vld [vmem:[%s452_s7] ss:$0 sm:$0xff] }
  0x12   :  { %234 = vmatmul.msk.bf16.vlgmr.msra.gmra.mxu0 %vm97_vm0, %v240_v1  ;;  %v130_v15 = vadd.s32 8, %v129_v11  ;;  %vm132_vm1 = vcmp.lt.s32.totalorder %v129_v11, %v131_v17 }
  0x14   :  { %vm133_vm2 = vcmp.lt.s32.totalorder %v130_v15, %v131_v17 }
  0x8f   :  { %v110_v2 = vpop.f32.mrf.mxu0 }
  0x90   :  { %v115_v4 = vsel %vm97_vm0, %v110_v2, 0.0 }
  0x97   :  { %v112_v3 = vpop.f32.mrf.mxu0 }
  0x98   :  { %v116_v5 = vsel %vm97_vm0, %v112_v3, 0.0 }
  0x99   :  { %v117_v6 = vadd.f32 %v116_v5, %v115_v4 }
  0x9b   :  { %v118_v7 = vrot.slane %v117_v6, 4 }
  0x9d   :  { %v119_v9 = vadd.f32 %v118_v7, %v117_v6 }
  0x9f   :  { %v120_v10 = vrot.slane %v119_v9, 2 }
  0xa1   :  { %v121_v12 = vadd.f32 %v120_v10, %v119_v9 }
  0xa3   :  { %v122_v13 = vrot.slane %v121_v12, 1 }
  0xa5   :  { %v123_v16 = vadd.f32 %v122_v13, %v121_v12 }
  0xa7   :  { %v125_v18 = vmul.f32 %v124_v14, %v123_v16 }
  0xa9   :  { %v126_v19 = vsub.f32 %v110_v2, %v125_v18  ;;  %v127_v20 = vsub.f32 %v112_v3, %v125_v18 }
  0xab   :  { %v134_v21 = vsel %vm132_vm1, %v126_v19, 0.0  ;;  %v135_v22 = vsel %vm133_vm2, %v127_v20, 0.0 }
  0xac   :  { %v136_v23 = vmul.f32 %v134_v21, %v134_v21  ;;  %v137_v24 = vmul.f32 %v135_v22, %v135_v22 }
  0xae   :  { %v138_v25 = vsel %vm97_vm0, %v136_v23, 0.0  ;;  %v139_v26 = vsel %vm97_vm0, %v137_v24, 0.0 }
  0xaf   :  { %v140_v27 = vadd.f32 %v139_v26, %v138_v25 }
  0xb1   :  { %v141_v28 = vrot.slane %v140_v27, 4 }
  0xb3   :  { %v142_v29 = vadd.f32 %v141_v28, %v140_v27 }
  0xb5   :  { %v143_v30 = vrot.slane %v142_v29, 2 }
  0xb7   :  { %v144_v31 = vadd.f32 %v143_v30, %v142_v29 }
  0xb9   :  { %v145_v32 = vrot.slane %v144_v31, 1 }
  0xbb   :  { %v146_v34 = vadd.f32 %v145_v32, %v144_v31 }
  0xbd   :  { %v147_v35 = vmul.f32 %v146_v34, %v124_v14 }
  0xbf   :  { %v149_v36 = vadd.f32 1e-05, %v147_v35 }
  0xc1   :  { %253 = vrsqrt.f32 %v149_v36  ;;  %vm156_vm4 = vweird.f32 %v149_v36 }
  0xc7   :  { %v254_v37 = vpop.eup %253 }
  0xc8   :  { %v151_v38 = vmul.f32 %v254_v37, %v149_v36  ;;  %vm157_vm3 = vweird.f32 %v254_v37 }
  0xc9   :  { %vm158_vm5 = vmor %vm156_vm4, %vm157_vm3 }
  0xca   :  { %v152_v39 = vmul.f32 %v254_v37, %v151_v38 }
  0xcc   :  { %v153_v40 = vmul.f32 0.5, %v152_v39 }
  0xce   :  { %v154_v41 = vsub.f32 1.5, %v153_v40 }
  0xd0   :  { %v155_v43 = vmul.f32 %v254_v37, %v154_v41 }
  0xd2   :  { %v159_v44 = vsel %vm158_vm5, %v254_v37, %v155_v43 }
  0xd3   :  { %v160_v45 = vmul.f32 %v159_v44, %v148_v42 }
  0xd5   :  { %v162_v46 = vperm.slane %v160_v45, 0 }
  0xd7   :  { %v164_v48 = vmul.f32 %v162_v46, %v126_v19  ;;  %v165_v49 = vmul.f32 %v162_v46, %v127_v20 }
  0xd9   :  { %v171_v50 = vadd.f32 %v251_v47, %v165_v49  ;;  %v170_v51 = vadd.f32 %v251_v47, %v164_v48 }
  0xdb   :  { %v173_v52 = vmax.f32 %v171_v50, 0.0  ;;  %v172_v53 = vmax.f32 %v170_v51, 0.0 }
  0xdd   :  { %v174_v54 = vpack.c.bf16 %v173_v52, %v172_v53 }
  0xdf   :  { %239 = vmatmul.msk.bf16.vlgmr.msra.gmra.mxu1 %vm97_vm0, %v174_v54 }
 0x15c   :  { %v199_v56 = vpop.f32.mrf.mxu1 }
 0x15d   :  { %v200_v57 = vadd.f32 %v252_v55, %v199_v56 }
 0x15f   :  { %204 = vst.msk [vmem:[#allocation10] sm:$0xff] %vm97_vm0, %v200_v57 }
 0x164   :  { %v201_v58 = vpop.f32.mrf.mxu1 }
 0x165   :  { %v202_v59 = vadd.f32 %v252_v55, %v201_v58 }
 0x167   :  { %205 = vst.msk [vmem:[#allocation10 + $0x8] sm:$0xff] %vm97_vm0, %v202_v59 }
 0x168   :  { %218 = dma.vmem_to_hbm [thread:$0]  %s211_s27, 256, %s213_s29, [#allocation6], %s363_s30, %s363_s30, %s364_s9  }
 0x169   :  { %355 = dma.done.wait [#allocation6], 256  }
 0x16a   :  { %356 = vsyncadd [#allocation6], 4294967040 }
 0x16b   :  { %223 = vsyncpa [#allocation5], 1 }
 0x16c   :  { %224 = vsyncpa [#allocation8], 1 }
 0x16d   :  { %225 = vsyncpa [#allocation6], 1 }

</bundles_post_ra>
